<compile_context>
chip_gen: v6e
topology: v6e:2x2x1
jax: 0.10.0
libtpu: 0.0.40
codegen_flags: <defaults>
</compile_context>

<pallas_src>
import jax
import jax.numpy as jnp
from jax.experimental import pallas as pl
from jax.experimental.pallas import tpu as pltpu


def _mlp_kernel(x_ref, w1_ref, b1_ref, w2_ref, b2_ref, w3_ref, b3_ref, o_ref):
    x = x_ref[...]                                             # (TB, 10)

    # Layer 1: (64, 10) contracted with (TB, 10) on their last dims -> (64, TB).
    # Same NT orientation as q @ k.T; keeps the result lane-dense over batch.
    h1 = jax.lax.dot_general(
        w1_ref[...], x,
        dimension_numbers=(((1,), (1,)), ((), ())),
        preferred_element_type=jnp.float32)
    h1 = jnp.maximum(h1 + b1_ref[...], 0.0)                    # (64, TB)
    # Dropout(0.3): identity at inference.

    # Layer 2: (32, 64) @ (64, TB) -> (32, TB)
    h2 = jnp.dot(w2_ref[...], h1, preferred_element_type=jnp.float32)
    h2 = jnp.maximum(h2 + b2_ref[...], 0.0)                    # (32, TB)
    # Dropout(0.3): identity at inference.

    # Layer 3 (out_features=1): VPU multiply + sublane reduction instead of an
    # M=1 MXU matmul; result is directly the lane-dense (1, TB) output row.
    z = jnp.sum(h2 * w3_ref[...], axis=0, keepdims=True) + b3_ref[...]

    o_ref[0] = jax.nn.sigmoid(z).astype(o_ref.dtype)           # (1, TB)


def glaucoma_classifier(x, params, *, tb=None):
    """x: (B, num_signs) float -> (B, 1) float32 probabilities."""
    w1, b1, w2, b2, w3, b3 = params
    B, F = x.shape

    if tb is None:
        # Lane-dense batch tile: multiple of 128, capped at 2048 rows so the
        # double-buffered (TB, 10) tile plus (64|32, TB) intermediates stay
        # far below scoped-VMEM defaults on every chip generation.
        tb = min(2048, max(128, ((B + 127) // 128) * 128))
    assert tb % 128 == 0, "batch tile must be a multiple of 128 lanes"

    grid_n = pl.cdiv(B, tb)
    b_pad = grid_n * tb
    if b_pad != B:
        x = jnp.pad(x, ((0, b_pad - B), (0, 0)))

    nbytes = lambda a: a.size * a.dtype.itemsize
    cost = pl.CostEstimate(
        flops=2 * b_pad * (F * 64 + 64 * 32 + 32),
        transcendentals=b_pad,                                  # sigmoid
        bytes_accessed=nbytes(x) + 4 * b_pad + sum(nbytes(p) for p in params),
    )

    out = pl.pallas_call(
        _mlp_kernel,
        out_shape=jax.ShapeDtypeStruct((grid_n, 1, tb), jnp.float32),
        grid=(grid_n,),
        in_specs=[
            # Streamed, auto double-buffered batch tile.
            pl.BlockSpec((tb, F), lambda i: (i, 0)),
            # Weights / biases: constant index_map -> fetched once, VMEM-resident.
            pl.BlockSpec(w1.shape, lambda i: (0, 0)),
            pl.BlockSpec(b1.shape, lambda i: (0, 0)),
            pl.BlockSpec(w2.shape, lambda i: (0, 0)),
            pl.BlockSpec(b2.shape, lambda i: (0, 0)),
            pl.BlockSpec(w3.shape, lambda i: (0, 0)),
            pl.BlockSpec(b3.shape, lambda i: (0, 0)),
        ],
        out_specs=pl.BlockSpec((1, 1, tb), lambda i: (i, 0, 0)),
        compiler_params=pltpu.CompilerParams(
            dimension_semantics=("parallel",),                  # megacore on v7x
        ),
        cost_estimate=cost,
    )(x, w1, b1, w2, b2, w3, b3)

    return out.reshape(b_pad, 1)[:B]


def init_params(key, num_signs=10):
    """Deterministic synthetic parameters.

    Weight layout matches PyTorch nn.Linear (out_features, in_features) for
    the first two layers; the last layer's (1, 32) weight is stored as a
    (32, 1) column so it broadcasts against the (32, TB) activations.
    Biases are (out_features, 1) columns for clean lane-broadcasting.
    """
    dims = [(num_signs, 64), (64, 32), (32, 1)]
    params = []
    for fan_in, fan_out in dims:
        kw, kb, key = jax.random.split(key, 3)
        bound = 1.0 / float(fan_in) ** 0.5
        w = jax.random.uniform(kw, (fan_out, fan_in), jnp.float32, -bound, bound)
        b = jax.random.uniform(kb, (fan_out, 1), jnp.float32, -bound, bound)
        params.extend([w, b])
    w1, b1, w2, b2, w3, b3 = params
    return (w1, b1, w2, b2, w3.T, b3)   # w3 stored as a (32, 1) column


def reference(x, params):
    """Plain-JAX reference of the same forward pass (batch-major)."""
    w1, b1, w2, b2, w3, b3 = params
    h1 = jnp.maximum(x @ w1.T + b1[:, 0], 0.0)
    h2 = jnp.maximum(h1 @ w2.T + b2[:, 0], 0.0)
    return jax.nn.sigmoid(h2 @ w3 + b3[0])


if __name__ == "__main__":
    key = jax.random.PRNGKey(0)
    kx, kx2, kp = jax.random.split(key, 3)

    NUM_SIGNS = 10
    params = init_params(kp, NUM_SIGNS)

    # Small demo batch (single grid step, padded to one 128-row tile).
    B = 8
    x = jax.random.normal(kx, (B, NUM_SIGNS), jnp.float32)
    out = jax.block_until_ready(glaucoma_classifier(x, params))
    ref = reference(x, params)
    assert out.shape == (B, 1)
    assert jnp.allclose(out, ref, atol=1e-4, rtol=1e-4), \
        float(jnp.max(jnp.abs(out - ref)))

    # Multi-tile grid + ragged-batch padding path.
    B2 = 300
    x2 = jax.random.normal(kx2, (B2, NUM_SIGNS), jnp.float32)
    out2 = jax.block_until_ready(glaucoma_classifier(x2, params, tb=128))
    ref2 = reference(x2, params)
    assert out2.shape == (B2, 1)
    assert jnp.allclose(out2, ref2, atol=1e-4, rtol=1e-4), \
        float(jnp.max(jnp.abs(out2 - ref2)))

    print("KERNEL_OK")
</pallas_src>

<mosaic_0001>
module attributes {stable_mosaic.version = 11 : i64} {
  func.func @_mlp_kernel(%arg0: i32, %arg1: memref<128x10xf32, #tpu.memory_space<vmem>>, %arg2: memref<64x10xf32, #tpu.memory_space<vmem>>, %arg3: memref<64x1xf32, #tpu.memory_space<vmem>>, %arg4: memref<32x64xf32, #tpu.memory_space<vmem>>, %arg5: memref<32x1xf32, #tpu.memory_space<vmem>>, %arg6: memref<32x1xf32, #tpu.memory_space<vmem>>, %arg7: memref<1x1xf32, #tpu.memory_space<vmem>>, %arg8: memref<1x1x128xf32, #tpu.memory_space<vmem>>) attributes {dimension_semantics = [#tpu.dimension_semantics<parallel>], iteration_bounds = array<i64: 1>, scalar_prefetch = 0 : i64, scratch_operands = 0 : i64, tpu.core_type = #tpu.core_type<tc>, window_params = [{transform_indices = @transform_0, window_bounds = array<i64: 128, 10>}, {pipeline_mode = #tpu.pipeline_mode<synchronous>, transform_indices = @transform_1, window_bounds = array<i64: 64, 10>}, {pipeline_mode = #tpu.pipeline_mode<synchronous>, transform_indices = @transform_2, window_bounds = array<i64: 64, 1>}, {pipeline_mode = #tpu.pipeline_mode<synchronous>, transform_indices = @transform_3, window_bounds = array<i64: 32, 64>}, {pipeline_mode = #tpu.pipeline_mode<synchronous>, transform_indices = @transform_4, window_bounds = array<i64: 32, 1>}, {pipeline_mode = #tpu.pipeline_mode<synchronous>, transform_indices = @transform_5, window_bounds = array<i64: 32, 1>}, {pipeline_mode = #tpu.pipeline_mode<synchronous>, transform_indices = @transform_6, window_bounds = array<i64: 1, 1>}, {transform_indices = @transform_7, window_bounds = array<i64: 1, 1, 128>}]} {
    %c0 = arith.constant 0 : index
    %c0_0 = arith.constant 0 : index
    %0 = vector.load %arg1[%c0, %c0_0] : memref<128x10xf32, #tpu.memory_space<vmem>>, vector<128x10xf32>
    %c0_1 = arith.constant 0 : index
    %c0_2 = arith.constant 0 : index
    %1 = vector.load %arg2[%c0_1, %c0_2] : memref<64x10xf32, #tpu.memory_space<vmem>>, vector<64x10xf32>
    %cst = arith.constant dense<0.000000e+00> : vector<64x128xf32>
    %2 = tpu.matmul %1, %0, %cst {dimension_numbers = #tpu.dot_dimension_numbers<[1], [1], [0], [0], [0, 0, 1, 0], [], []>} : vector<64x10xf32>, vector<128x10xf32>, vector<64x128xf32> -> vector<64x128xf32>
    %c0_3 = arith.constant 0 : index
    %c0_4 = arith.constant 0 : index
    %3 = vector.load %arg3[%c0_3, %c0_4] : memref<64x1xf32, #tpu.memory_space<vmem>>, vector<64x1xf32>
    %4 = vector.broadcast %3 : vector<64x1xf32> to vector<64x128xf32>
    %5 = arith.addf %2, %4 : vector<64x128xf32>
    %cst_5 = arith.constant 0.000000e+00 : f32
    %6 = vector.broadcast %cst_5 : f32 to vector<64x128xf32>
    %7 = arith.maximumf %5, %6 : vector<64x128xf32>
    %c0_6 = arith.constant 0 : index
    %c0_7 = arith.constant 0 : index
    %8 = vector.load %arg4[%c0_6, %c0_7] : memref<32x64xf32, #tpu.memory_space<vmem>>, vector<32x64xf32>
    %cst_8 = arith.constant dense<0.000000e+00> : vector<32x128xf32>
    %9 = tpu.matmul %8, %7, %cst_8 {dimension_numbers = #tpu.dot_dimension_numbers<[1], [0], [0], [1], [0, 0, 1, 1], [], []>} : vector<32x64xf32>, vector<64x128xf32>, vector<32x128xf32> -> vector<32x128xf32>
    %c0_9 = arith.constant 0 : index
    %c0_10 = arith.constant 0 : index
    %10 = vector.load %arg5[%c0_9, %c0_10] : memref<32x1xf32, #tpu.memory_space<vmem>>, vector<32x1xf32>
    %11 = vector.broadcast %10 : vector<32x1xf32> to vector<32x128xf32>
    %12 = arith.addf %9, %11 : vector<32x128xf32>
    %cst_11 = arith.constant 0.000000e+00 : f32
    %13 = vector.broadcast %cst_11 : f32 to vector<32x128xf32>
    %14 = arith.maximumf %12, %13 : vector<32x128xf32>
    %c0_12 = arith.constant 0 : index
    %c0_13 = arith.constant 0 : index
    %15 = vector.load %arg6[%c0_12, %c0_13] : memref<32x1xf32, #tpu.memory_space<vmem>>, vector<32x1xf32>
    %16 = vector.broadcast %15 : vector<32x1xf32> to vector<32x128xf32>
    %17 = arith.mulf %14, %16 : vector<32x128xf32>
    %cst_14 = arith.constant dense<0.000000e+00> : vector<128xf32>
    %18 = vector.multi_reduction <add>, %17, %cst_14 [0] : vector<32x128xf32> to vector<128xf32>
    %19 = vector.shape_cast %18 : vector<128xf32> to vector<1x128xf32>
    %c0_15 = arith.constant 0 : index
    %c0_16 = arith.constant 0 : index
    %20 = vector.load %arg7[%c0_15, %c0_16] : memref<1x1xf32, #tpu.memory_space<vmem>>, vector<1x1xf32>
    %21 = vector.broadcast %20 : vector<1x1xf32> to vector<1x128xf32>
    %22 = arith.addf %19, %21 : vector<1x128xf32>
    %23 = arith.negf %22 : vector<1x128xf32>
    %24 = math.exp %23 : vector<1x128xf32>
    %cst_17 = arith.constant 1.000000e+00 : f32
    %25 = vector.broadcast %cst_17 : f32 to vector<1x128xf32>
    %26 = arith.addf %25, %24 : vector<1x128xf32>
    %27 = arith.divf %25, %26 : vector<1x128xf32>
    %c0_18 = arith.constant 0 : index
    %c0_19 = arith.constant 0 : index
    %c0_20 = arith.constant 0 : index
    %28 = vector.load %arg8[%c0_18, %c0_19, %c0_20] : memref<1x1x128xf32, #tpu.memory_space<vmem>>, vector<1x1x128xf32>
    %29 = vector.shape_cast %28 : vector<1x1x128xf32> to vector<1x128xf32>
    %30 = vector.shape_cast %27 : vector<1x128xf32> to vector<1x1x128xf32>
    tpu.vector_store %arg8[%c0_18, %c0_19, %c0_20], %30 {strides = array<i32>} : memref<1x1x128xf32, #tpu.memory_space<vmem>>, vector<1x1x128xf32>,
    return
  }
  func.func @transform_0(%arg0: i32) -> (i32, i32) {
    %c0_i32 = arith.constant 0 : i32
    %c0_i32_0 = arith.constant 0 : i32
    return %arg0, %c0_i32 : i32, i32
  }
  func.func @transform_1(%arg0: i32) -> (i32, i32) {
    %c0_i32 = arith.constant 0 : i32
    %c0_i32_0 = arith.constant 0 : i32
    %c0_i32_1 = arith.constant 0 : i32
    return %c0_i32, %c0_i32_0 : i32, i32
  }
  func.func @transform_2(%arg0: i32) -> (i32, i32) {
    %c0_i32 = arith.constant 0 : i32
    %c0_i32_0 = arith.constant 0 : i32
    %c0_i32_1 = arith.constant 0 : i32
    return %c0_i32, %c0_i32_0 : i32, i32
  }
  func.func @transform_3(%arg0: i32) -> (i32, i32) {
    %c0_i32 = arith.constant 0 : i32
    %c0_i32_0 = arith.constant 0 : i32
    %c0_i32_1 = arith.constant 0 : i32
    return %c0_i32, %c0_i32_0 : i32, i32
  }
  func.func @transform_4(%arg0: i32) -> (i32, i32) {
    %c0_i32 = arith.constant 0 : i32
    %c0_i32_0 = arith.constant 0 : i32
    %c0_i32_1 = arith.constant 0 : i32
    return %c0_i32, %c0_i32_0 : i32, i32
  }
  func.func @transform_5(%arg0: i32) -> (i32, i32) {
    %c0_i32 = arith.constant 0 : i32
    %c0_i32_0 = arith.constant 0 : i32
    %c0_i32_1 = arith.constant 0 : i32
    return %c0_i32, %c0_i32_0 : i32, i32
  }
  func.func @transform_6(%arg0: i32) -> (i32, i32) {
    %c0_i32 = arith.constant 0 : i32
    %c0_i32_0 = arith.constant 0 : i32
    %c0_i32_1 = arith.constant 0 : i32
    return %c0_i32, %c0_i32_0 : i32, i32
  }
  func.func @transform_7(%arg0: i32) -> (i32, i32, i32) {
    %c0_i32 = arith.constant 0 : i32
    %c0_i32_0 = arith.constant 0 : i32
    %c0_i32_1 = arith.constant 0 : i32
    return %arg0, %c0_i32, %c0_i32_0 : i32, i32, i32
  }
}

</mosaic_0001>

<bundles_post_ra>
// kernel: tpu_custom_call.1
= control target key start
LH: loop header
LB: loop body
LE: loop exit
PB: predicated region body
PF: predicated region fallthrough
CT: control target
= control target key end

     0   :  { %s871_s0 = inlined_call_operand.vmem [shape: f32[128,10], index: 0, kind: input, shape index: {}]   ;;  %s872_s1 = inlined_call_operand.vmem [shape: f32[64,10], index: 1, kind: input, shape index: {}]   ;;  %s873_s2 = inlined_call_operand.vmem [shape: f32[64,1], index: 2, kind: input, shape index: {}]   ;;  %s874_s3 = inlined_call_operand.vmem [shape: f32[32,64], index: 3, kind: input, shape index: {}]   ;;  %s875_s4 = inlined_call_operand.vmem [shape: f32[32,1], index: 4, kind: input, shape index: {}]   ;;  %s876_s5 = inlined_call_operand.vmem [shape: f32[32,1], index: 5, kind: input, shape index: {}]   ;;  %s877_s6 = inlined_call_operand.<no memory space> [shape: f32[1,1], index: 6, kind: input, shape index: {}]   ;;  %s878_s7 = inlined_call_operand.hbm [shape: f32[1,1,128], index: 7, kind: output, shape index: {}]  }
   0x1   :  { %v12_v0 = vstv %s877_s6 }
   0x2   :  { %13 = vst [vmem:[#allocation2] sm:$0x1] %v12_v0 }
   0x3   :  { %v44_v1 = vld [vmem:[%s871_s0 + $0x78] sm:$0xff]  ;;  %vm101_vm0 = vcmask 80896   ;;  %v43_v2 = vld [vmem:[%s871_s0 + $0x70] sm:$0xff]  ;;  %v647_v3 = vmov 0   ;;  %v42_v4 = vld [vmem:[%s871_s0 + $0x68] sm:$0xff] }
   0x4   :  { %551 = vmatprep.subr.msk.mxu0 %vm101_vm0, %v44_v1  ;;  %619 = vset.pattern.permute.xlu0 %v647_v3  ;;  %v45_v5 = vld [vmem:[%s872_s1] sm:$0xff]  ;;  %v60_v7 = vld [vmem:[%s873_s2 + $0x38] sm:$0xff]  ;;  %v58_v8 = vld [vmem:[%s873_s2 + $0x28] sm:$0xff] }
   0x5   :  { %552 = vmatpush3.xpose.msk.msra.mxu0 %vm101_vm0, %v44_v1  ;;  %620 = vset.pattern.permute.xlu1 %v647_v3  ;;  %v41_v6 = vld [vmem:[%s871_s0 + $0x60] sm:$0xff]  ;;  %v59_v9 = vld [vmem:[%s873_s2 + $0x30] sm:$0xff]  ;;  %v40_v11 = vld [vmem:[%s871_s0 + $0x58] sm:$0xff] }
   0x6   :  { %553 = vmatprep.subr.msk.mxu0 %vm101_vm0, %v43_v2  ;;  %583 = vmatprep.mubr.msk.f32.mxu0 %vm101_vm0, %v45_v5  ;;  %v57_v10 = vld [vmem:[%s873_s2 + $0x20] sm:$0xff] }
   0x7   :  { %98 = vperm.xlu0 %619, %v60_v7   ;;  %88 = vperm.xlu1 %620, %v58_v8  }
   0x9   :  { %554 = vmatpush3.xpose.msk.msra.mxu0 %vm101_vm0, %v43_v2 }
   0xa   :  { %555 = vmatprep.subr.msk.mxu0 %vm101_vm0, %v42_v4 }
   0xb   :  { %93 = vperm.xlu0 %619, %v59_v9   ;;  %83 = vperm.xlu1 %620, %v57_v10  }
   0xd   :  { %556 = vmatpush3.xpose.msk.msra.mxu0 %vm101_vm0, %v42_v4 }
   0xe   :  { %557 = vmatprep.subr.msk.mxu0 %vm101_vm0, %v41_v6 }
   0xf   :  { %14 = vsyncpa [#allocation4], 0  ;;  %v56_v12 = vld [vmem:[%s873_s2 + $0x18] sm:$0xff]  ;;  %v55_v13 = vld [vmem:[%s873_s2 + $0x10] sm:$0xff]  ;;  %vm315_vm1 = vcmask 523264  }
  0x10   :  { %v39_v14 = vld [vmem:[%s871_s0 + $0x50] sm:$0xff]  ;;  %78 = vperm.xlu0 %619, %v56_v12   ;;  %73 = vperm.xlu1 %620, %v55_v13   ;;  %v54_v15 = vld [vmem:[%s873_s2 + $0x8] sm:$0xff]  ;;  %v53_v16 = vld [vmem:[%s873_s2] sm:$0xff] }
  0x11   :  { %558 = vmatpush3.xpose.msk.msra.mxu0 %vm101_vm0, %v41_v6  ;;  %v38_v17 = vld [vmem:[%s871_s0 + $0x48] sm:$0xff]  ;;  %v291_v18 = vld [vmem:[%s875_s4] sm:$0xff]  ;;  %v293_v21 = vld [vmem:[%s875_s4 + $0x10] sm:$0xff] }
  0x12   :  { %559 = vmatprep.subr.msk.mxu0 %vm101_vm0, %v40_v11  ;;  %v292_v19 = vld [vmem:[%s875_s4 + $0x8] sm:$0xff]  ;;  %v37_v20 = vld [vmem:[%s871_s0 + $0x40] sm:$0xff]  ;;  %v294_v22 = vld [vmem:[%s875_s4 + $0x18] sm:$0xff] }
  0x13   :  { %v36_v23 = vld [vmem:[%s871_s0 + $0x38] sm:$0xff]  ;;  %v417_v24 = vld [vmem:[%s876_s5] sm:$0xff]  ;;  %v418_v25 = vld [vmem:[%s876_s5 + $0x8] sm:$0xff] }
  0x14   :  { %68 = vperm.xlu0 %619, %v54_v15   ;;  %63 = vperm.xlu1 %620, %v53_v16   ;;  %v35_v26 = vld [vmem:[%s871_s0 + $0x30] sm:$0xff]  ;;  %v420_v28 = vld [vmem:[%s876_s5 + $0x18] sm:$0xff]  ;;  %v34_v29 = vld [vmem:[%s871_s0 + $0x28] sm:$0xff] }
  0x15   :  { %560 = vmatpush3.xpose.msk.msra.mxu0 %vm101_vm0, %v40_v11  ;;  %v419_v27 = vld [vmem:[%s876_s5 + $0x10] sm:$0xff]  ;;  %v454_v30 = vld [vmem:[#allocation2] sm:$0x1]  ;;  %v32_v32 = vld [vmem:[%s871_s0 + $0x18] sm:$0xff] }
  0x16   :  { %561 = vmatprep.subr.msk.mxu0 %vm101_vm0, %v39_v14  ;;  %v33_v31 = vld [vmem:[%s871_s0 + $0x20] sm:$0xff]  ;;  %v31_v33 = vld [vmem:[%s871_s0 + $0x10] sm:$0xff]  ;;  %v30_v34 = vld [vmem:[%s871_s0 + $0x8] sm:$0xff] }
  0x17   :  { %v29_v35 = vld [vmem:[%s871_s0] sm:$0xff]  ;;  %v46_v36 = vld [vmem:[%s872_s1 + $0x8] sm:$0xff]  ;;  %v47_v37 = vld [vmem:[%s872_s1 + $0x10] sm:$0xff] }
  0x18   :  { %297 = vperm.xlu0 %619, %v291_v18   ;;  %302 = vperm.xlu1 %620, %v292_v19   ;;  %v48_v38 = vld [vmem:[%s872_s1 + $0x18] sm:$0xff]  ;;  %v49_v39 = vld [vmem:[%s872_s1 + $0x20] sm:$0xff]  ;;  %v50_v40 = vld [vmem:[%s872_s1 + $0x28] sm:$0xff] }
  0x19   :  { %562 = vmatpush3.xpose.msk.msra.mxu0 %vm101_vm0, %v39_v14  ;;  %v51_v41 = vld [vmem:[%s872_s1 + $0x30] sm:$0xff]  ;;  %v52_v42 = vld [vmem:[%s872_s1 + $0x38] sm:$0xff]  ;;  %v287_v43 = vld [vmem:[%s874_s3] sm:$0xff] }
  0x1a   :  { %563 = vmatprep.subr.msk.mxu0 %vm101_vm0, %v38_v17  ;;  %611 = vmatprep.mubr.msk.f32.mxu1 %vm315_vm1, %v287_v43  ;;  %v288_v12 = vld [vmem:[%s874_s3 + $0x8] sm:$0xff]  ;;  %v289_v13 = vld [vmem:[%s874_s3 + $0x10] sm:$0xff]  ;;  %v290_v14 = vld [vmem:[%s874_s3 + $0x18] sm:$0xff]  ;;  %s648_s3 = smov [#allocation3]  }
  0x1b   :  { %s478_s10 = sshll.u32 %s648_s3, 4  ;;  %s479_s10 = int_to_ptr.vmem [resolvable:$true] %s478_s10 }
  0x1c   :  { %307 = vperm.xlu0 %619, %v293_v21   ;;  %312 = vperm.xlu1 %620, %v294_v22   ;;  %s625_s11 = scalar_lea.vmem %s479_s10, 16  ;;  %s629_s12 = scalar_lea.vmem %s479_s10, 32 }
  0x1d   :  { %564 = vmatpush3.xpose.msk.msra.mxu0 %vm101_vm0, %v38_v17  ;;  %p626_p0 = scmp.ne.s32.totalorder %s479_s10, %s625_s11  ;;  %p630_p1 = scmp.lt.s32.totalorder %s479_s10, %s479_s10 }
  0x1e   :  { %565 = vmatprep.subr.msk.mxu0 %vm101_vm0, %v37_v20  ;;  %p631_p2 = scmp.lt.s32.totalorder %s629_s12, %s625_s11 }
  0x20   :  { %423 = vperm.xlu0 %619, %v417_v24   ;;  %428 = vperm.xlu1 %620, %v418_v25   ;;  %p632_p3 = por %p631_p2, %p630_p1 }
  0x21   :  { %566 = vmatpush3.xpose.msk.msra.mxu0 %vm101_vm0, %v37_v20 }
  0x22   :  { %567 = vmatprep.subr.msk.mxu0 %vm101_vm0, %v36_v23  ;;  %p633_p4 = pnand %p632_p3, %p626_p0 }
  0x24   :  { %433 = vperm.xlu0 %619, %v419_v27   ;;  %438 = vperm.xlu1 %620, %v420_v28  }
  0x25   :  { %568 = vmatpush3.xpose.msk.msra.mxu0 %vm101_vm0, %v36_v23 }
  0x26   :  { %569 = vmatprep.subr.msk.mxu0 %vm101_vm0, %v35_v26 }
  0x28   :  { %457 = vperm.xlu0 %619, %v454_v30  }
  0x29   :  { %570 = vmatpush3.xpose.msk.msra.mxu0 %vm101_vm0, %v35_v26 }
  0x2a   :  { %571 = vmatprep.subr.msk.mxu0 %vm101_vm0, %v34_v29 }
  0x2d   :  { %572 = vmatpush3.xpose.msk.msra.mxu0 %vm101_vm0, %v34_v29 }
  0x2e   :  { %573 = vmatprep.subr.msk.mxu0 %vm101_vm0, %v33_v31 }
  0x31   :  { %574 = vmatpush3.xpose.msk.msra.mxu0 %vm101_vm0, %v33_v31 }
  0x32   :  { %575 = vmatprep.subr.msk.mxu0 %vm101_vm0, %v32_v32 }
  0x35   :  { %576 = vmatpush3.xpose.msk.msra.mxu0 %vm101_vm0, %v32_v32 }
  0x36   :  { %577 = vmatprep.subr.msk.mxu0 %vm101_vm0, %v31_v33 }
  0x39   :  { %578 = vmatpush3.xpose.msk.msra.mxu0 %vm101_vm0, %v31_v33 }
  0x3a   :  { %579 = vmatprep.subr.msk.mxu0 %vm101_vm0, %v30_v34 }
  0x3d   :  { %580 = vmatpush3.xpose.msk.msra.mxu0 %vm101_vm0, %v30_v34 }
  0x3e   :  { %581 = vmatprep.subr.msk.mxu0 %vm101_vm0, %v29_v35 }
  0x41   :  { %582 = vmatpush3.xpose.msk.msra.mxu0 %vm101_vm0, %v29_v35 }
  0x44   :  { %584 = vmatmul.mubr.msk.f32.vlgmr.msra.gmra.mxu0 %vm101_vm0, %v46_v36 }
  0x45   :  { %586 = vmatprep.mubr.msk.f32.mxu0 %vm101_vm0, %v47_v37 }
  0x48   :  { %587 = vmatmul.mubr.msk.f32.gmra.mxu0 %vm101_vm0, %v48_v38 }
  0x49   :  { %589 = vmatprep.mubr.msk.f32.mxu0 %vm101_vm0, %v49_v39 }
  0x4c   :  { %590 = vmatmul.mubr.msk.f32.gmra.mxu0 %vm101_vm0, %v50_v40 }
  0x4d   :  { %592 = vmatprep.mubr.msk.f32.mxu0 %vm101_vm0, %v51_v41  ;;  %v460_v41 = vlaneseq }
  0x50   :  { %593 = vmatmul.mubr.msk.f32.gmra.mxu0 %vm101_vm0, %v52_v42 }
  0x82   :  { %v99_v46 = vpop.permute.xlu0 %98  ;;  %v89_v48 = vpop.permute.xlu1 %88 }
  0x86   :  { %v94_v51 = vpop.permute.xlu0 %93  ;;  %v84_v53 = vpop.permute.xlu1 %83 }
  0x8b   :  { %v79_v60 = vpop.permute.xlu0 %78  ;;  %v74_v63 = vpop.permute.xlu1 %73 }
  0x8f   :  { %v69_v4 = vpop.permute.xlu0 %68  ;;  %v64_v7 = vpop.permute.xlu1 %63 }
  0x93   :  { %v298_v15 = vpop.permute.xlu0 %297  ;;  %v303_v16 = vpop.permute.xlu1 %302 }
  0x97   :  { %v308_v17 = vpop.permute.xlu0 %307  ;;  %v313_v18 = vpop.permute.xlu1 %312 }
  0x9b   :  { %v424_v23 = vpop.permute.xlu0 %423  ;;  %v429_v28 = vpop.permute.xlu1 %428 }
  0x9f   :  { %v434_v35 = vpop.permute.xlu0 %433  ;;  %v439_v38 = vpop.permute.xlu1 %438 }
 0x104   :  { %v585_v44 = vpop.f32.mrf.mxu0 }
 0x105   :  { %v246_v5 = vadd.f32 %v585_v44, %v69_v4  ;;  %v461_v44 = vshrl.u32 %v460_v41, 7 }
 0x106   :  { %v240_v45 = vpop.f32.mrf.mxu0 }
 0x107   :  { %v241_v8 = vadd.f32 %v240_v45, %v64_v7  ;;  %v280_v10 = vmax.f32 %v246_v5, 0.0 }
 0x108   :  { %v588_v47 = vpop.f32.mrf.mxu0 }
 0x109   :  { %v256_v0 = vadd.f32 %v588_v47, %v79_v60  ;;  %v279_v11 = vmax.f32 %v241_v8, 0.0  ;;  %v462_v47 = vsub.s32 0, %v461_v44 }
 0x10a   :  { %v250_v49 = vpop.f32.mrf.mxu0 }
 0x10b   :  { %v251_v2 = vadd.f32 %v250_v49, %v74_v63  ;;  %v282_v6 = vmax.f32 %v256_v0, 0.0  ;;  %v458_v49 = vpop.permute.xlu0 %457 }
 0x10c   :  { %v591_v50 = vpop.f32.mrf.mxu0 }
 0x10d   :  { %v266_v57 = vadd.f32 %v591_v50, %v89_v48  ;;  %v281_v9 = vmax.f32 %v251_v2, 0.0 }
 0x10e   :  { %v260_v52 = vpop.f32.mrf.mxu0 }
 0x10f   :  { %v261_v61 = vadd.f32 %v260_v52, %v84_v53  ;;  %v284_v1 = vmax.f32 %v266_v57, 0.0 }
 0x110   :  { %v594_v54 = vpop.f32.mrf.mxu0 }
 0x111   :  { %v276_v55 = vadd.f32 %v594_v54, %v99_v46  ;;  %v283_v3 = vmax.f32 %v261_v61, 0.0 }
 0x112   :  { %v270_v56 = vpop.f32.mrf.mxu0 }
 0x113   :  { %v286_v58 = vmax.f32 %v276_v55, 0.0  ;;  %v271_v59 = vadd.f32 %v270_v56, %v94_v51  ;;  %v463_v51 = vrot.slane %v458_v49, %v462_v47 }
 0x115   :  { %v285_v62 = vmax.f32 %v271_v59, 0.0  ;;  %595 = vmatprep.subr.mxu1 %v286_v58 }
 0x116   :  { %596 = vmatpush3.msra.mxu1 %v286_v58 }
 0x117   :  { %597 = vmatprep.subr.mxu1 %v285_v62 }
 0x118   :  { %598 = vmatpush3.msra.mxu1 %v285_v62 }
 0x119   :  { %599 = vmatprep.subr.mxu1 %v284_v1 }
 0x11a   :  { %600 = vmatpush3.msra.mxu1 %v284_v1 }
 0x11b   :  { %601 = vmatprep.subr.mxu1 %v283_v3 }
 0x11c   :  { %602 = vmatpush3.msra.mxu1 %v283_v3 }
 0x11d   :  { %603 = vmatprep.subr.mxu1 %v282_v6 }
 0x11e   :  { %604 = vmatpush3.msra.mxu1 %v282_v6 }
 0x11f   :  { %605 = vmatprep.subr.mxu1 %v281_v9 }
 0x120   :  { %606 = vmatpush3.msra.mxu1 %v281_v9 }
 0x121   :  { %607 = vmatprep.subr.mxu1 %v280_v10 }
 0x122   :  { %608 = vmatpush3.msra.mxu1 %v280_v10 }
 0x123   :  { %609 = vmatprep.subr.mxu1 %v279_v11 }
 0x124   :  { %610 = vmatpush3.msra.mxu1 %v279_v11 }
 0x125   :  { %612 = vmatmul.mubr.msk.f32.vlgmr.msra.gmra.mxu1 %vm315_vm1, %v288_v12 }
 0x126   :  { %614 = vmatprep.mubr.msk.f32.mxu1 %vm315_vm1, %v289_v13 }
 0x129   :  { %615 = vmatmul.mubr.msk.f32.gmra.mxu1 %vm315_vm1, %v290_v14 }
 0x1e5   :  { %v613_v19 = vpop.f32.mrf.mxu1 }
 0x1e6   :  { %v400_v20 = vadd.f32 %v613_v19, %v303_v16 }
 0x1e7   :  { %v394_v21 = vpop.f32.mrf.mxu1 }
 0x1e8   :  { %v395_v22 = vadd.f32 %v394_v21, %v298_v15  ;;  %v414_v25 = vmax.f32 %v400_v20, 0.0 }
 0x1e9   :  { %v616_v24 = vpop.f32.mrf.mxu1 }
 0x1ea   :  { %v413_v26 = vmax.f32 %v395_v22, 0.0  ;;  %v410_v27 = vadd.f32 %v616_v24, %v313_v18  ;;  %v442_v32 = vmul.f32 %v429_v28, %v414_v25 }
 0x1eb   :  { %v404_v29 = vpop.f32.mrf.mxu1 }
 0x1ec   :  { %v441_v30 = vmul.f32 %v424_v23, %v413_v26  ;;  %v405_v31 = vadd.f32 %v404_v29, %v308_v17  ;;  %v416_v33 = vmax.f32 %v410_v27, 0.0 }
 0x1ee   :  { %v415_v34 = vmax.f32 %v405_v31, 0.0  ;;  %v445_v36 = vadd.f32 %v442_v32, %v441_v30  ;;  %v444_v39 = vmul.f32 %v439_v38, %v416_v33 }
 0x1f0   :  { %v443_v37 = vmul.f32 %v434_v35, %v415_v34 }
 0x1f2   :  { %v446_v40 = vadd.f32 %v445_v36, %v443_v37 }
 0x1f4   :  { %v447_v42 = vadd.f32 %v446_v40, %v444_v39 }
 0x1f6   :  { %v448_v43 = vrot.slane %v447_v42, 4 }
 0x1f8   :  { %v449_v45 = vadd.f32 %v448_v43, %v447_v42 }
 0x1fa   :  { %v450_v46 = vrot.slane %v449_v45, 2 }
 0x1fc   :  { %v451_v48 = vadd.f32 %v450_v46, %v449_v45 }
 0x1fe   :  { %v452_v50 = vrot.slane %v451_v48, 1 }
 0x200   :  { %v453_v52 = vadd.f32 %v452_v50, %v451_v48 }
 0x202   :  { %v464_v53 = vadd.f32 %v463_v51, %v453_v52 }
 0x204   :  { %v514_v54 = vmul.f32 -1.442695, %v464_v53 }
 0x206   :  { %621 = vpow2.f32 %v514_v54 }
 0x213   :  { %v622_v55 = vpop.eup %621 }
 0x214   :  { %v468_v56 = vadd.f32 1.0, %v622_v55 }
 0x216   :  { %623 = vrcp.f32 %v468_v56 }
 0x223   :  { %v624_v57 = vpop.eup %623 }
 0x224   :  { %471 = vst [vmem:[#allocation3] sm:$0x1] %v624_v57 }
 0x225   :  { %636 = shalt.err (!%p633_p4)
}
 0x226   :  { %481 = dma.vmem_to_hbm [thread:$0]  %s479_s10, 16, %s878_s7, [#allocation4]  }
 0x227   :  { %645 = dma.done.wait [#allocation4], 16  }
 0x228   :  { %646 = vsyncadd [#allocation4], 4294967280 }
 0x229   :  { %485 = vsyncpa [#allocation4], 1 }

</bundles_post_ra>
